<compile_context>
chip_gen: v7x
topology: tpu7x:2x2x1
jax: 0.10.0
libtpu: 0.0.40
codegen_flags: <defaults>
</compile_context>

<pallas_src>
import jax
import jax.numpy as jnp
from jax import lax
from jax.experimental import pallas as pl
from jax.experimental.pallas import tpu as pltpu


def _conv3x3_lrelu_kernel(x_ref, w_ref, b_ref, o_ref):
    """Fused 3x3 conv (stride 1, pad pre-applied) + LeakyReLU(0.2) for Nb images.

    x_ref: (Nb, H+2, Kp)        f32   padded input, (width, chan) flat on lanes
    w_ref: (3*Kp, W*Cout)       bf16  banded weights, dy-major along K
    b_ref: (1, W*Cout)          f32   bias, tiled across W
    o_ref: (Nb, H, W*Cout)      f32   lane-dense output
    """
    nb, hp2, kp = x_ref.shape
    h = hp2 - 2

    # Three row-shifted views concatenated along the (lane-aligned) last axis,
    # then batch rows stacked into the MXU M dimension: (Nb*H, 3*Kp).
    xcat = jnp.concatenate(
        [x_ref[:, pl.ds(dy, h), :] for dy in range(3)], axis=-1)   # f32 in VMEM
    xm = xcat.reshape(nb * h, 3 * kp).astype(jnp.bfloat16)

    # Single MXU contraction: M = Nb*H, K = 3*Kp, N = W*Cout (lane dense).
    acc = jnp.dot(xm, w_ref[...], preferred_element_type=jnp.float32)

    acc = acc + b_ref[...]                         # (1, W*Cout) broadcasts over rows
    acc = jnp.where(acc > 0.0, acc, 0.2 * acc)     # LeakyReLU(0.2), f32 epilogue
    o_ref[...] = acc.reshape(nb, h, -1).astype(o_ref.dtype)


def _build_banded_weight(w, width, wp):
    """(Cout, Cin, 3, 3) torch-layout weights -> (3, wp*Cin, W*Cout) banded.

    band[dy, w_in*Cin + c, w*Cout + o] = w[o, c, dy, w_in - w]  if 0 <= w_in-w < 3
                                         else 0
    so that  acc[h, w*Cout+o] = sum_{dy,w_in,c} xpad[h+dy, w_in, c] * band[dy, ...]
    reproduces the 3x3 cross-correlation with padding 1 (extra right-pad columns
    beyond w_in = W+1 are zero in both x and the band).
    """
    cout, cin, kh, kw = w.shape
    wt = jnp.transpose(w, (2, 3, 1, 0))                 # (kh, kw, cin, cout)
    w_in = jnp.arange(wp)[:, None]                      # (wp, 1)
    w_out = jnp.arange(width)[None, :]                  # (1, W)
    dx = w_in - w_out                                   # (wp, W)
    valid = (dx >= 0) & (dx < kw)
    band = wt[:, jnp.clip(dx, 0, kw - 1)]               # (kh, wp, W, cin, cout)
    band = jnp.where(valid[None, :, :, None, None], band, 0.0)
    band = jnp.transpose(band, (0, 1, 3, 2, 4))         # (kh, wp, cin, W, cout)
    return band.reshape(kh, wp * cin, width * cout)


def conv_layer_pallas(x_nchw, w, b):
    """ConvLayer.forward: x (N,Cin,H,W) f32, w (Cout,Cin,3,3), b (Cout,) -> (N,Cout,H,W)."""
    N, Cin, H, W = x_nchw.shape
    Cout = w.shape[0]
    assert w.shape[1:] == (Cin, 3, 3), w.shape
    WCout = W * Cout

    # Lane-pad the flattened (width, channel) axis up to a multiple of 128 by
    # growing the right spatial zero padding (when Cin divides evenly), so the
    # in-kernel concat and all row loads are lane-aligned.
    k_raw = (W + 2) * Cin
    k_pad = ((k_raw + 127) // 128) * 128
    if k_pad % Cin == 0:
        wp = k_pad // Cin
    else:                      # fall back to the unpadded 56%-lane layout
        wp, k_pad = W + 2, k_raw
    right_pad = wp - W - 1

    # NCHW -> NHWC, pad (top/bottom = 1, left = 1, right = 1 + lane pad),
    # flatten (wp, Cin) onto the lane axis. Single pad op; reshape is free.
    x_nhwc = jnp.transpose(x_nchw, (0, 2, 3, 1))
    xpad = jnp.pad(x_nhwc, ((0, 0), (1, 1), (1, right_pad), (0, 0)))
    x2d = xpad.reshape(N, H + 2, k_pad)

    # Banded weights, dy-major along the fused K axis: (3*Kp, W*Cout) bf16.
    w_band = _build_banded_weight(w, W, wp).astype(jnp.bfloat16)
    w_band = w_band.reshape(3 * k_pad, WCout)
    b_row = jnp.tile(b, W).reshape(1, WCout).astype(jnp.float32)

    # Batch blocking: stack Nb images into the MXU M dimension (M = Nb*H),
    # targeting ~256 rows (v6e/v7x MXU height), capped at N.
    nb = max(1, min(N, pl.cdiv(256, H)))
    n_steps = pl.cdiv(N, nb)
    n_padded = n_steps * nb
    if n_padded != N:
        x2d = jnp.pad(x2d, ((0, n_padded - N), (0, 0), (0, 0)))

    cost = pl.CostEstimate(
        # Report the banded MAC count actually issued on the MXU.
        flops=2 * n_padded * H * (3 * k_pad) * WCout,
        transcendentals=0,
        bytes_accessed=(x2d.size * 4 + w_band.size * 2 + b_row.size * 4
                        + n_padded * H * WCout * 4),
    )

    out = pl.pallas_call(
        _conv3x3_lrelu_kernel,
        out_shape=jax.ShapeDtypeStruct((n_padded, H, WCout), jnp.float32),
        grid=(n_steps,),
        in_specs=[
            pl.BlockSpec((nb, H + 2, k_pad), lambda n: (n, 0, 0)),   # activations
            pl.BlockSpec((3 * k_pad, WCout), lambda n: (0, 0)),      # banded weights
            pl.BlockSpec((1, WCout), lambda n: (0, 0)),              # bias row
        ],
        out_specs=pl.BlockSpec((nb, H, WCout), lambda n: (n, 0, 0)),
        compiler_params=pltpu.CompilerParams(
            dimension_semantics=("parallel",),       # sharded across TCs on v7x
            vmem_limit_bytes=32 * 1024 * 1024,       # explicit, v7x-safe budget
        ),
        cost_estimate=cost,
    )(x2d, w_band, b_row)

    # Strip batch padding; (N, H, W*Cout) -> (N, H, W, Cout) (free) -> NCHW.
    out = out[:N]
    return jnp.transpose(out.reshape(N, H, W, Cout), (0, 3, 1, 2))


conv_layer_forward = jax.jit(conv_layer_pallas)


def _reference_forward(x_nchw, w, b):
    """Pure-JAX f32 reference (lax.conv, HIGHEST precision) for correctness."""
    y = lax.conv_general_dilated(
        x_nchw, w, window_strides=(1, 1), padding=((1, 1), (1, 1)),
        dimension_numbers=("NCHW", "OIHW", "NCHW"),
        precision=lax.Precision.HIGHEST)
    y = y + b.reshape(1, -1, 1, 1)
    return jnp.where(y > 0, y, 0.2 * y)


if __name__ == "__main__":
    key = jax.random.PRNGKey(0)
    kx, kw, kb = jax.random.split(key, 3)

    # ConvLayer(in_dim=4, out_dim=8) applied to x of shape (2, 4, 16, 16)
    N, Cin, H, W, Cout = 2, 4, 16, 16, 8
    x = jax.random.normal(kx, (N, Cin, H, W), jnp.float32)
    bound = (Cin * 3 * 3) ** -0.5            # nn.Conv2d default init bound
    w = jax.random.uniform(kw, (Cout, Cin, 3, 3), jnp.float32, -bound, bound)
    b = jax.random.uniform(kb, (Cout,), jnp.float32, -bound, bound)

    out = jax.block_until_ready(conv_layer_forward(x, w, b))
    ref = jax.block_until_ready(_reference_forward(x, w, b))

    assert out.shape == (N, Cout, H, W), out.shape
    # bf16 MXU operands with f32 accumulation -> loosened tolerance vs the pure
    # f32 reference.
    max_err = float(jnp.max(jnp.abs(out - ref)))
    assert jnp.allclose(out, ref, atol=2e-2, rtol=2e-2), max_err

    print("KERNEL_OK")
</pallas_src>

<mosaic_0001>
module attributes {stable_mosaic.version = 11 : i64} {
  func.func @_conv3x3_lrelu_kernel(%arg0: i32, %arg1: memref<2x18x128xf32, #tpu.memory_space<vmem>>, %arg2: memref<384x128xbf16, #tpu.memory_space<vmem>>, %arg3: memref<1x128xf32, #tpu.memory_space<vmem>>, %arg4: memref<2x16x128xf32, #tpu.memory_space<vmem>>) attributes {dimension_semantics = [#tpu.dimension_semantics<parallel>], iteration_bounds = array<i64: 1>, scalar_prefetch = 0 : i64, scratch_operands = 0 : i64, tpu.core_type = #tpu.core_type<tc>, window_params = [{transform_indices = @transform_0, window_bounds = array<i64: 2, 18, 128>}, {pipeline_mode = #tpu.pipeline_mode<synchronous>, transform_indices = @transform_1, window_bounds = array<i64: 384, 128>}, {pipeline_mode = #tpu.pipeline_mode<synchronous>, transform_indices = @transform_2, window_bounds = array<i64: 1, 128>}, {transform_indices = @transform_3, window_bounds = array<i64: 2, 16, 128>}]} {
    %c0 = arith.constant 0 : index
    %c0_0 = arith.constant 0 : index
    %c0_1 = arith.constant 0 : index
    %0 = vector.load %arg1[%c0, %c0_0, %c0_1] : memref<2x18x128xf32, #tpu.memory_space<vmem>>, vector<2x16x128xf32>
    %c0_2 = arith.constant 0 : index
    %c1 = arith.constant 1 : index
    %c0_3 = arith.constant 0 : index
    %1 = vector.load %arg1[%c0_2, %c1, %c0_3] : memref<2x18x128xf32, #tpu.memory_space<vmem>>, vector<2x16x128xf32>
    %c0_4 = arith.constant 0 : index
    %c2 = arith.constant 2 : index
    %c0_5 = arith.constant 0 : index
    %2 = vector.load %arg1[%c0_4, %c2, %c0_5] : memref<2x18x128xf32, #tpu.memory_space<vmem>>, vector<2x16x128xf32>
    %3 = tpu.concatenate %0, %1, %2 in 2 : vector<2x16x128xf32>, vector<2x16x128xf32>, vector<2x16x128xf32> -> vector<2x16x384xf32>
    %4 = vector.shape_cast %3 : vector<2x16x384xf32> to vector<32x384xf32>
    %5 = arith.truncf %4 : vector<32x384xf32> to vector<32x384xbf16>
    %c0_6 = arith.constant 0 : index
    %c0_7 = arith.constant 0 : index
    %6 = vector.load %arg2[%c0_6, %c0_7] : memref<384x128xbf16, #tpu.memory_space<vmem>>, vector<384x128xbf16>
    %cst = arith.constant dense<0.000000e+00> : vector<32x128xf32>
    %7 = tpu.matmul %5, %6, %cst {dimension_numbers = #tpu.dot_dimension_numbers<[1], [0], [0], [1], [0, 0, 1, 1], [], []>} : vector<32x384xbf16>, vector<384x128xbf16>, vector<32x128xf32> -> vector<32x128xf32>
    %c0_8 = arith.constant 0 : index
    %c0_9 = arith.constant 0 : index
    %8 = vector.load %arg3[%c0_8, %c0_9] : memref<1x128xf32, #tpu.memory_space<vmem>>, vector<1x128xf32>
    %9 = vector.broadcast %8 : vector<1x128xf32> to vector<32x128xf32>
    %10 = arith.addf %7, %9 : vector<32x128xf32>
    %cst_10 = arith.constant 0.000000e+00 : f32
    %11 = vector.broadcast %cst_10 : f32 to vector<32x128xf32>
    %12 = arith.cmpf ogt, %10, %11 : vector<32x128xf32>
    %cst_11 = arith.constant 2.000000e-01 : f32
    %13 = vector.broadcast %cst_11 : f32 to vector<32x128xf32>
    %14 = arith.mulf %13, %10 : vector<32x128xf32>
    %15 = arith.select %12, %10, %14 : vector<32x128xi1>, vector<32x128xf32>
    %16 = vector.shape_cast %15 : vector<32x128xf32> to vector<2x16x128xf32>
    %c0_12 = arith.constant 0 : index
    %c0_13 = arith.constant 0 : index
    %c0_14 = arith.constant 0 : index
    %17 = vector.load %arg4[%c0_12, %c0_13, %c0_14] : memref<2x16x128xf32, #tpu.memory_space<vmem>>, vector<2x16x128xf32>
    tpu.vector_store %arg4[%c0_12, %c0_13, %c0_14], %16 {strides = array<i32>} : memref<2x16x128xf32, #tpu.memory_space<vmem>>, vector<2x16x128xf32>,
    return
  }
  func.func @transform_0(%arg0: i32) -> (i32, i32, i32) {
    %c0_i32 = arith.constant 0 : i32
    %c0_i32_0 = arith.constant 0 : i32
    %c0_i32_1 = arith.constant 0 : i32
    return %arg0, %c0_i32, %c0_i32_0 : i32, i32, i32
  }
  func.func @transform_1(%arg0: i32) -> (i32, i32) {
    %c0_i32 = arith.constant 0 : i32
    %c0_i32_0 = arith.constant 0 : i32
    %c0_i32_1 = arith.constant 0 : i32
    return %c0_i32, %c0_i32_0 : i32, i32
  }
  func.func @transform_2(%arg0: i32) -> (i32, i32) {
    %c0_i32 = arith.constant 0 : i32
    %c0_i32_0 = arith.constant 0 : i32
    %c0_i32_1 = arith.constant 0 : i32
    return %c0_i32, %c0_i32_0 : i32, i32
  }
  func.func @transform_3(%arg0: i32) -> (i32, i32, i32) {
    %c0_i32 = arith.constant 0 : i32
    %c0_i32_0 = arith.constant 0 : i32
    %c0_i32_1 = arith.constant 0 : i32
    return %arg0, %c0_i32, %c0_i32_0 : i32, i32, i32
  }
}

</mosaic_0001>

<bundles_post_ra>
// kernel: tile.8
= control target key start
LH: loop header
LB: loop body
LE: loop exit
PB: predicated region body
PF: predicated region fallthrough
CT: control target
= control target key end

     0   :  { %s28_s0 = inlined_call_operand.vmem [shape: f32[8], index: 0, kind: input, shape index: {}]   ;;  %s29_s1 = inlined_call_operand.vmem [shape: f32[16,8], index: 1, kind: output, shape index: {}]  }
   0x1   :  { %v4_v0 = vld [vmem:[%s28_s0] ss:$0 sm:$0xff] }
   0x2   :  { %5 = vst [vmem:[%s29_s1] sm:$0xff] %v4_v0  ;;  %8 = vst [vmem:[%s29_s1 + $0x8] sm:$0xff] %v4_v0 }

// kernel: tile.9
= control target key start
LH: loop header
LB: loop body
LE: loop exit
PB: predicated region body
PF: predicated region fallthrough
CT: control target
= control target key end

     0   :  { %s131_s10 = smov 120   ;;  %s132_s11 = smov 104   ;;  %vm3_vm0 = vcmask 64512   ;;  %vm9_vm1 = vcmask 1048512   ;;  %vm15_vm2 = vcmask 982912   ;;  %vm21_vm3 = vcmask 917312   ;;  %s207_s0 = inlined_call_operand.vmem [shape: f32[16,8], index: 0, kind: input, shape index: {}]   ;;  %s208_s1 = inlined_call_operand.vmem [shape: f32[1,128], index: 1, kind: output, shape index: {}]  }
   0x1   :  { %v101_v0 = vld [vmem:[%s207_s0 + $0xf] sm:$0x1]   ;;  %v103_v1 = vld [vmem:[%s207_s0 + $0xd] sm:$0x1]   ;;  %v102_v2 = vld [vmem:[%s207_s0 + $0xe] sm:$0x1]  }
   0x2   :  { %7 = vrot.lane.b32.xlu0 %v101_v0, %s131_s10  ;;  %19 = vrot.lane.b32.xlu1 %v103_v1, %s132_s11  ;;  %v104_v3 = vld [vmem:[%s207_s0 + $0xc] sm:$0x1]   ;;  %s133_s16 = smov 112   ;;  %s134_s17 = smov 96   ;;  %v105_v4 = vld [vmem:[%s207_s0 + $0xb] sm:$0x1]  }
   0x3   :  { %v106_v5 = vld [vmem:[%s207_s0 + $0xa] sm:$0x1]   ;;  %v2_v6 = vld [vmem:[%s207_s0] sm:$0x1]   ;;  %s135_s24 = smov 88   ;;  %s136_s25 = smov 80  }
   0x4   :  { %4 = vst.msk [vmem:[#allocation0] sm:$0x1] %vm3_vm0, %v2_v6   ;;  %v107_v7 = vld [vmem:[%s207_s0 + $0x9] sm:$0x1]   ;;  %v108_v8 = vld [vmem:[%s207_s0 + $0x8] sm:$0x1]  }
   0x5   :  { %s137_s30 = smov 72   ;;  %s138_s2 = smov 64   ;;  %v109_v9 = vld [vmem:[%s207_s0 + $0x7] sm:$0x1]   ;;  %v110_v10 = vld [vmem:[%s207_s0 + $0x6] sm:$0x1]  }
   0x6   :  { %13 = vrot.lane.b32.xlu0 %v102_v2, %s133_s16  ;;  %25 = vrot.lane.b32.xlu1 %v104_v3, %s134_s17  ;;  %s139_s7 = smov 56   ;;  %s140_s8 = smov 48   ;;  %v111_v11 = vld [vmem:[%s207_s0 + $0x5] sm:$0x1]   ;;  %v112_v12 = vld [vmem:[%s207_s0 + $0x4] sm:$0x1]  }
   0x7   :  { %s141_s13 = smov 40   ;;  %s142_s14 = smov 32   ;;  %v113_v13 = vld [vmem:[%s207_s0 + $0x3] sm:$0x1]   ;;  %v114_v14 = vld [vmem:[%s207_s0 + $0x2] sm:$0x1]  }
   0x8   :  { %s143_s19 = smov 24   ;;  %s144_s20 = smov 16   ;;  %v115_v15 = vld [vmem:[%s207_s0 + $0x1] sm:$0x1]   ;;  %vm27_vm4 = vcmask 851712   ;;  %vm33_vm5 = vcmask 786112  }
   0x9   :  { %s145_s0 = smov 8   ;;  %vm39_vm6 = vcmask 720512   ;;  %vm45_vm7 = vcmask 654912   ;;  %vm51_vm8 = vcmask 589312   ;;  %vm57_vm9 = vcmask 523712  }
   0xa   :  { %31 = vrot.lane.b32.xlu0 %v105_v4, %s135_s24  ;;  %37 = vrot.lane.b32.xlu1 %v106_v5, %s136_s25  ;;  %vm63_vm10 = vcmask 458112   ;;  %vm69_vm11 = vcmask 392512   ;;  %vm75_vm12 = vcmask 326912   ;;  %vm81_vm13 = vcmask 261312  }
   0xb   :  { %vm87_vm14 = vcmask 195712   ;;  %vm93_vm15 = vcmask 130112  }
   0xe   :  { %43 = vrot.lane.b32.xlu0 %v107_v7, %s137_s30  ;;  %49 = vrot.lane.b32.xlu1 %v108_v8, %s138_s2 }
  0x12   :  { %55 = vrot.lane.b32.xlu0 %v109_v9, %s139_s7  ;;  %61 = vrot.lane.b32.xlu1 %v110_v10, %s140_s8 }
  0x16   :  { %67 = vrot.lane.b32.xlu0 %v111_v11, %s141_s13  ;;  %73 = vrot.lane.b32.xlu1 %v112_v12, %s142_s14 }
  0x1a   :  { %79 = vrot.lane.b32.xlu0 %v113_v13, %s143_s19  ;;  %85 = vrot.lane.b32.xlu1 %v114_v14, %s144_s20 }
  0x1e   :  { %91 = vrot.lane.b32.xlu0 %v115_v15, %s145_s0 }
  0x74   :  { %v8_v16 = vpop.permute.xlu0 %7   ;;  %v20_v17 = vpop.permute.xlu1 %19  }
  0x75   :  { %10 = vst.msk [vmem:[#allocation0] sm:$0x1] %vm9_vm1, %v8_v16  }
  0x78   :  { %v14_v18 = vpop.permute.xlu0 %13   ;;  %v26_v19 = vpop.permute.xlu1 %25  }
  0x79   :  { %16 = vst.msk [vmem:[#allocation0] sm:$0x1] %vm15_vm2, %v14_v18  }
  0x7a   :  { %22 = vst.msk [vmem:[#allocation0] sm:$0x1] %vm21_vm3, %v20_v17  }
  0x7b   :  { %28 = vst.msk [vmem:[#allocation0] sm:$0x1] %vm27_vm4, %v26_v19  }
  0x7c   :  { %v32_v20 = vpop.permute.xlu0 %31   ;;  %v38_v21 = vpop.permute.xlu1 %37  }
  0x7d   :  { %34 = vst.msk [vmem:[#allocation0] sm:$0x1] %vm33_vm5, %v32_v20  }
  0x7e   :  { %40 = vst.msk [vmem:[#allocation0] sm:$0x1] %vm39_vm6, %v38_v21  }
  0x80   :  { %v44_v22 = vpop.permute.xlu0 %43   ;;  %v50_v23 = vpop.permute.xlu1 %49  }
  0x81   :  { %46 = vst.msk [vmem:[#allocation0] sm:$0x1] %vm45_vm7, %v44_v22  }
  0x82   :  { %52 = vst.msk [vmem:[#allocation0] sm:$0x1] %vm51_vm8, %v50_v23  }
  0x84   :  { %v56_v24 = vpop.permute.xlu0 %55   ;;  %v62_v25 = vpop.permute.xlu1 %61  }
  0x85   :  { %58 = vst.msk [vmem:[#allocation0] sm:$0x1] %vm57_vm9, %v56_v24  }
  0x86   :  { %64 = vst.msk [vmem:[#allocation0] sm:$0x1] %vm63_vm10, %v62_v25  }
  0x88   :  { %v68_v26 = vpop.permute.xlu0 %67   ;;  %v74_v27 = vpop.permute.xlu1 %73  }
  0x89   :  { %70 = vst.msk [vmem:[#allocation0] sm:$0x1] %vm69_vm11, %v68_v26  }
  0x8a   :  { %76 = vst.msk [vmem:[#allocation0] sm:$0x1] %vm75_vm12, %v74_v27  }
  0x8c   :  { %v80_v28 = vpop.permute.xlu0 %79   ;;  %v86_v29 = vpop.permute.xlu1 %85  }
  0x8d   :  { %82 = vst.msk [vmem:[#allocation0] sm:$0x1] %vm81_vm13, %v80_v28  }
  0x8e   :  { %88 = vst.msk [vmem:[#allocation0] sm:$0x1] %vm87_vm14, %v86_v29  }
  0x90   :  { %v92_v30 = vpop.permute.xlu0 %91  }
  0x91   :  { %94 = vst.msk [vmem:[#allocation0] sm:$0x1] %vm93_vm15, %v92_v30  }
  0x98   :  { %v98_v31 = vld [vmem:[#allocation0] sm:$0x1] }
  0x99   :  { %100 = vst [vmem:[%s208_s1] sm:$0x1] %v98_v31 }

// kernel: conv_layer_pallas.1
= control target key start
LH: loop header
LB: loop body
LE: loop exit
PB: predicated region body
PF: predicated region fallthrough
CT: control target
= control target key end

     0   :  { %s600_s1 = inlined_call_operand.vmem [shape: bf16[384,128], index: 1, kind: input, shape index: {}]   ;;  %s601_s0 = inlined_call_operand.vmem [shape: f32[2,18,128], index: 0, kind: input, shape index: {}]   ;;  %s602_s2 = inlined_call_operand.vmem [shape: f32[1,128], index: 2, kind: input, shape index: {}]   ;;  %s603_s3 = inlined_call_operand.vmem [shape: f32[2,16,128], index: 3, kind: output, shape index: {}]  }
   0x1   :  { %v433_v0 = vld [vmem:[%s600_s1 + $0x40] sm:$0xff]   ;;  %v435_v2 = vld [vmem:[%s600_s1 + $0x48] sm:$0xff]   ;;  %v438_v5 = vld [vmem:[%s600_s1 + $0x50] sm:$0xff]  }
   0x2   :  { %v434_v1 = vld [vmem:[%s600_s1] sm:$0xff]   ;;  %375 = vmatprep.subr.bf16.mxu0 %v433_v0  ;;  %v437_v4 = vld [vmem:[%s600_s1 + $0x8] sm:$0xff]   ;;  %v440_v7 = vld [vmem:[%s600_s1 + $0x10] sm:$0xff]  }
   0x3   :  { %376 = vmatpush3.bf16.msra.mxu0 %v434_v1  ;;  %v436_v3 = vld [vmem:[%s600_s1 + $0x80] sm:$0xff]   ;;  %v439_v6 = vld [vmem:[%s600_s1 + $0x88] sm:$0xff]   ;;  %v441_v8 = vld [vmem:[%s600_s1 + $0x58] sm:$0xff]  }
   0x4   :  { %377 = vmatprep.subr.bf16.mxu0 %v435_v2  ;;  %413 = vmatprep.subr.bf16.mxu1 %v436_v3  ;;  %v442_v9 = vld [vmem:[%s600_s1 + $0x90] sm:$0xff]   ;;  %v443_v10 = vld [vmem:[%s600_s1 + $0x18] sm:$0xff]   ;;  %v444_v11 = vld [vmem:[%s600_s1 + $0x60] sm:$0xff]  }
   0x5   :  { %414 = vmatpush3.bf16.msra.mxu1 %v436_v3  ;;  %v445_v12 = vld [vmem:[%s600_s1 + $0x98] sm:$0xff]   ;;  %v446_v13 = vld [vmem:[%s600_s1 + $0x20] sm:$0xff]   ;;  %v447_v15 = vld [vmem:[%s600_s1 + $0x68] sm:$0xff]  }
   0x6   :  { %415 = vmatprep.subr.bf16.mxu1 %v439_v6  ;;  %v448_v14 = vld [vmem:[%s600_s1 + $0xa0] sm:$0xff]   ;;  %v449_v16 = vld [vmem:[%s600_s1 + $0x28] sm:$0xff]   ;;  %v450_v18 = vld [vmem:[%s600_s1 + $0x70] sm:$0xff]  }
   0x7   :  { %378 = vmatpush3.bf16.msra.mxu0 %v437_v4  ;;  %v451_v17 = vld [vmem:[%s600_s1 + $0xa8] sm:$0xff]   ;;  %v452_v19 = vld [vmem:[%s600_s1 + $0x30] sm:$0xff]   ;;  %v453_v23 = vld [vmem:[%s600_s1 + $0x78] sm:$0xff]  }
   0x8   :  { %379 = vmatprep.subr.bf16.mxu0 %v438_v5  ;;  %v454_v20 = vld [vmem:[%s600_s1 + $0xb0] sm:$0xff]   ;;  %v19_v21 = vld [vmem:[%s601_s0 + $0x1] sm:$0xff]  ;;  %v455_v27 = vld [vmem:[%s600_s1 + $0x38] sm:$0xff]  }
   0x9   :  { %416 = vmatpush3.bf16.msra.mxu1 %v439_v6  ;;  %v20_v22 = vld [vmem:[%s601_s0 + $0x9] sm:$0xff]  ;;  %v15_v29 = vld [vmem:[%s601_s0] sm:$0xff]  ;;  %v456_v31 = vld [vmem:[%s600_s1 + $0xb8] sm:$0xff]  }
   0xa   :  { %417 = vmatprep.subr.bf16.mxu1 %v442_v9  ;;  %v28_v24 = vpack.c.bf16 %v20_v22, %v19_v21  ;;  %v23_v25 = vld [vmem:[%s601_s0 + $0x2] sm:$0xff]  ;;  %v24_v26 = vld [vmem:[%s601_s0 + $0xa] sm:$0xff]  ;;  %v21_v32 = vld [vmem:[%s601_s0 + $0x19] sm:$0xff] }
   0xb   :  { %380 = vmatpush3.bf16.msra.mxu0 %v440_v7  ;;  %v29_v28 = vpack.c.bf16 %v24_v26, %v23_v25  ;;  %v16_v30 = vld [vmem:[%s601_s0 + $0x8] sm:$0xff]  ;;  %v25_v35 = vld [vmem:[%s601_s0 + $0x1a] sm:$0xff] }
   0xc   :  { %381 = vmatprep.subr.bf16.mxu0 %v441_v8  ;;  %264 = vmatprep.mubr.bf16.mxu0 %v28_v24  ;;  %v22_v33 = vld [vmem:[%s601_s0 + $0x21] sm:$0xff]  ;;  %v27_v34 = vpack.c.bf16 %v16_v30, %v15_v29  ;;  %v17_v39 = vld [vmem:[%s601_s0 + $0x18] sm:$0xff]  ;;  %v350_v44 = vld [vmem:[%s602_s2] ss:$0 sm:$0xff] }
   0xd   :  { %418 = vmatpush3.bf16.msra.mxu1 %v442_v9  ;;  %429 = vmatprep.mubr.bf16.mxu1 %v29_v28  ;;  %v26_v36 = vld [vmem:[%s601_s0 + $0x22] sm:$0xff]  ;;  %v31_v37 = vpack.c.bf16 %v22_v33, %v21_v32 }
   0xe   :  { %419 = vmatprep.subr.bf16.mxu1 %v445_v12  ;;  %v32_v38 = vpack.c.bf16 %v26_v36, %v25_v35  ;;  %v18_v40 = vld [vmem:[%s601_s0 + $0x20] sm:$0xff] }
   0xf   :  { %382 = vmatpush3.bf16.msra.mxu0 %v443_v10  ;;  %v30_v41 = vpack.c.bf16 %v18_v40, %v17_v39 }
  0x10   :  { %383 = vmatprep.subr.bf16.mxu0 %v444_v11 }
  0x11   :  { %420 = vmatpush3.bf16.msra.mxu1 %v445_v12 }
  0x12   :  { %421 = vmatprep.subr.bf16.mxu1 %v448_v14 }
  0x13   :  { %384 = vmatpush3.bf16.msra.mxu0 %v446_v13 }
  0x14   :  { %385 = vmatprep.subr.bf16.mxu0 %v447_v15 }
  0x15   :  { %422 = vmatpush3.bf16.msra.mxu1 %v448_v14 }
  0x16   :  { %423 = vmatprep.subr.bf16.mxu1 %v451_v17 }
  0x17   :  { %386 = vmatpush3.bf16.msra.mxu0 %v449_v16 }
  0x18   :  { %387 = vmatprep.subr.bf16.mxu0 %v450_v18 }
  0x19   :  { %424 = vmatpush3.bf16.msra.mxu1 %v451_v17 }
  0x1a   :  { %425 = vmatprep.subr.bf16.mxu1 %v454_v20 }
  0x1b   :  { %388 = vmatpush3.bf16.msra.mxu0 %v452_v19 }
  0x1c   :  { %389 = vmatprep.subr.bf16.mxu0 %v453_v23 }
  0x1d   :  { %426 = vmatpush3.bf16.msra.mxu1 %v454_v20 }
  0x1e   :  { %427 = vmatprep.subr.bf16.mxu1 %v456_v31 }
  0x1f   :  { %390 = vmatpush3.bf16.msra.mxu0 %v455_v27 }
  0x21   :  { %428 = vmatpush3.bf16.msra.mxu1 %v456_v31 }
  0x22   :  { %265 = vmatmul.mubr.bf16.vlgmr.msra.gmra.mrb[0].mxu0 %v27_v34 }
  0x23   :  { %272 = vmatprep.mubr.bf16.mxu0 %v31_v37 }
  0x24   :  { %430 = vmatmul.mubr.bf16.vlgmr.msra.gmra.mrb[0].mxu1 %v32_v38 }
  0x2a   :  { %273 = vmatmul.mubr.bf16.gmra.mrb[4].mxu0 %v30_v41 }
  0xf5   :  { %v391_v42 = vpop.f32.mrb[0].mxu0 }
  0xf6   :  { %v392_v43 = vpop.f32.mrb[1].mxu0 }
  0xf7   :  { %v393_v45 = vadd.f32 %v392_v43, %v391_v42  ;;  %v394_v46 = vpop.f32.mrb[2].mxu0  ;;  %v431_v48 = vpop.f32.mrb[0].mxu1 }
  0xf8   :  { %v395_v47 = vpop.f32.mrb[3].mxu0  ;;  %v315_v51 = vpop.f32.mrb[1].mxu1 }
  0xf9   :  { %v396_v49 = vadd.f32 %v395_v47, %v394_v46  ;;  %v267_v50 = vadd.f32 %v393_v45, %v350_v44  ;;  %v432_v52 = vpop.f32.mrb[2].mxu1 }
  0xfa   :  { %v318_v55 = vpop.f32.mrb[3].mxu1 }
  0xfb   :  { %v316_v53 = vadd.f32 %v315_v51, %v267_v50  ;;  %v270_v54 = vadd.f32 %v396_v49, %v350_v44 }
  0xfd   :  { %vm330_vm0 = vcmp.gt.f32.partialorder %v316_v53, 0.0  ;;  %v334_v56 = vmul.f32 0.2, %v316_v53  ;;  %v319_v57 = vadd.f32 %v318_v55, %v270_v54  ;;  %v397_v58 = vpop.f32.mrb[4].mxu0 }
  0xfe   :  { %v398_v59 = vpop.f32.mrb[5].mxu0 }
  0xff   :  { %v338_v60 = vsel %vm330_vm0, %v316_v53, %v334_v56  ;;  %vm331_vm1 = vcmp.gt.f32.partialorder %v319_v57, 0.0  ;;  %v335_v61 = vmul.f32 0.2, %v319_v57  ;;  %v399_v62 = vadd.f32 %v398_v59, %v397_v58  ;;  %v400_v63 = vpop.f32.mrb[6].mxu0 }
 0x100   :  { %342 = vst [vmem:[%s603_s3] sm:$0xff] %v338_v60  ;;  %v401_v0 = vpop.f32.mrb[7].mxu0 }
 0x101   :  { %v339_v1 = vsel %vm331_vm1, %v319_v57, %v335_v61  ;;  %v275_v2 = vadd.f32 %v399_v62, %v350_v44  ;;  %v402_v3 = vadd.f32 %v401_v0, %v400_v63 }
 0x102   :  { %343 = vst [vmem:[%s603_s3 + $0x8] sm:$0xff] %v339_v1 }
 0x103   :  { %v324_v4 = vadd.f32 %v431_v48, %v275_v2  ;;  %v278_v5 = vadd.f32 %v402_v3, %v350_v44 }
 0x105   :  { %vm332_vm2 = vcmp.gt.f32.partialorder %v324_v4, 0.0  ;;  %v336_v6 = vmul.f32 0.2, %v324_v4  ;;  %v327_v7 = vadd.f32 %v432_v52, %v278_v5 }
 0x107   :  { %v340_v8 = vsel %vm332_vm2, %v324_v4, %v336_v6  ;;  %vm333_vm3 = vcmp.gt.f32.partialorder %v327_v7, 0.0  ;;  %v337_v9 = vmul.f32 0.2, %v327_v7 }
 0x108   :  { %344 = vst [vmem:[%s603_s3 + $0x10] sm:$0xff] %v340_v8 }
 0x109   :  { %v341_v10 = vsel %vm333_vm3, %v327_v7, %v337_v9 }
 0x10a   :  { %345 = vst [vmem:[%s603_s3 + $0x18] sm:$0xff] %v341_v10 }

</bundles_post_ra>
